<compile_context>
chip_gen: v5e
topology: v5e:2x2
jax: 0.10.0
libtpu: 0.0.40
codegen_flags: <defaults>
</compile_context>

<pallas_src>
import jax
import jax.numpy as jnp
from jax.experimental import pallas as pl
from jax.experimental.pallas import tpu as pltpu


def attention_kernel(data_ref, w1_ref, b1_ref, w2t_ref, b2_ref,
                     scores_pad_ref, out_ref):
    # data_ref:       [B, L, D]   (first L sequence positions of every batch element)
    # w1_ref, b1_ref: [D, H], [1, H]
    # w2t_ref:        [1, H]      (= w2[:, 0] as a row; units[-1] == 1)
    # b2_ref:         [1, 1]
    # scores_pad_ref: [B, P, 1]
    # out_ref:        [B, D]
    B, L, D = data_ref.shape
    P = scores_pad_ref.shape[1]

    x = data_ref[...].astype(jnp.float32)                                # [B, L, D]

    # ---- Linear(D, H) + ReLU: one MXU matmul for the whole batch ----
    xf = x.reshape(B * L, D)
    h = jnp.dot(xf, w1_ref[...], preferred_element_type=jnp.float32) + b1_ref[...]
    h = jnp.maximum(h, 0.0)                                              # [B*L, H]

    # ---- Linear(H, 1): single output unit -> VPU multiply + lane reduction ----
    s = jnp.sum(h * w2t_ref[...], axis=-1, keepdims=True) + b2_ref[...]  # [B*L, 1]
    s = s.reshape(B, L, 1)

    # ---- softmax over the sequence axis (torch dim=-2) ----
    m = jnp.max(s, axis=1, keepdims=True)                                # [B, 1, 1]
    e = jnp.exp(s - m)
    p = e / jnp.sum(e, axis=1, keepdims=True)                            # [B, L, 1]

    # ---- weighted sum over the sequence axis ----
    out_ref[...] = jnp.sum(x * p, axis=1).astype(out_ref.dtype)          # [B, D]

    # ---- padded scores: build in registers, single full-tile store ----
    if P > L:
        p_full = jnp.concatenate(
            [p, jnp.zeros((B, P - L, 1), dtype=p.dtype)], axis=1)
    else:
        p_full = p
    scores_pad_ref[...] = p_full.astype(scores_pad_ref.dtype)


def attention_forward(data, unpadded_length, w1, b1, w2, b2, padded_length):
    """data: [B, P_in, D] float32; weights already in [in, out] layout;
    unpadded_length / padded_length are static python ints."""
    B, P_in, D = data.shape
    L = int(unpadded_length)
    H = w1.shape[1]
    S = w2.shape[1]
    P = int(padded_length)
    assert S == 1, "this attention module instance has units[-1] == 1"
    # TODO(synk): general S > 1 not implemented (the torch module's data*scores
    # broadcast itself only works for S == 1 or S == D).

    # Window the first L rows via the BlockSpec when the sublane rule allows it;
    # otherwise fall back to a wrapper-side slice (general L).
    if L == P_in or L % 8 == 0:
        x_in = data
    else:
        x_in = data[:, :L]

    b1_2d = b1.reshape(1, H)
    w2_row = w2.reshape(1, H)          # [H, 1] -> [1, H] (same flat order)
    b2_2d = b2.reshape(1, 1)

    scores_pad, out = pl.pallas_call(
        attention_kernel,
        out_shape=(
            jax.ShapeDtypeStruct((B, P, S), data.dtype),
            jax.ShapeDtypeStruct((B, D), data.dtype),
        ),
        grid=(1,),
        in_specs=[
            pl.BlockSpec((B, L, D), lambda i: (0, 0, 0)),   # window of first L rows
            pl.BlockSpec((D, H), lambda i: (0, 0)),
            pl.BlockSpec((1, H), lambda i: (0, 0)),
            pl.BlockSpec((1, H), lambda i: (0, 0)),
            pl.BlockSpec((1, 1), lambda i: (0, 0)),
        ],
        out_specs=(
            pl.BlockSpec((B, P, S), lambda i: (0, 0, 0)),
            pl.BlockSpec((B, D), lambda i: (0, 0)),
        ),
        compiler_params=pltpu.CompilerParams(
            dimension_semantics=("arbitrary",)),
    )(x_in, w1, b1_2d, w2_row, b2_2d)
    return scores_pad, out


def attention_reference(data, unpadded_length, w1, b1, w2, b2, padded_length):
    """Pure-JAX reference matching the torch forward."""
    L = int(unpadded_length)
    x = data[:, :L]
    h = jnp.maximum(x @ w1 + b1, 0.0)
    s = h @ w2 + b2
    p = jax.nn.softmax(s, axis=-2)
    out = jnp.sum(x * p, axis=-2)
    scores_pad = jnp.zeros((data.shape[0], padded_length, s.shape[-1]), s.dtype)
    scores_pad = scores_pad.at[:, :L, :].set(p)
    return scores_pad, out


if __name__ == "__main__":
    # module config: attention(units=[32, 16, 1], activations=['relu', 'none'],
    #                          padded_length=16)
    B, P, D, H, S = 2, 16, 32, 16, 1
    unpadded_length = 8

    key = jax.random.PRNGKey(0)
    k_data, k_w1, k_b1, k_w2, k_b2 = jax.random.split(key, 5)

    data = jax.random.normal(k_data, (B, P, D), dtype=jnp.float32)
    w1 = jax.random.normal(k_w1, (D, H), dtype=jnp.float32) * 0.1
    b1 = jax.random.normal(k_b1, (H,), dtype=jnp.float32) * 0.1
    w2 = jax.random.normal(k_w2, (H, S), dtype=jnp.float32) * 0.1
    b2 = jax.random.normal(k_b2, (S,), dtype=jnp.float32) * 0.1

    scores_pad, out = attention_forward(data, unpadded_length, w1, b1, w2, b2, P)
    jax.block_until_ready((scores_pad, out))

    ref_scores_pad, ref_out = attention_reference(
        data, unpadded_length, w1, b1, w2, b2, P)

    assert scores_pad.shape == (B, P, S) and out.shape == (B, D)
    assert jnp.allclose(scores_pad, ref_scores_pad, atol=1e-5, rtol=1e-5)
    assert jnp.allclose(out, ref_out, atol=1e-5, rtol=1e-5)

    print("KERNEL_OK")
</pallas_src>

<mosaic_0001>
module attributes {stable_mosaic.version = 11 : i64} {
  func.func @attention_kernel(%arg0: i32, %arg1: memref<2x8x32xf32, #tpu.memory_space<vmem>>, %arg2: memref<32x16xf32, #tpu.memory_space<vmem>>, %arg3: memref<1x16xf32, #tpu.memory_space<vmem>>, %arg4: memref<1x16xf32, #tpu.memory_space<vmem>>, %arg5: memref<1x1xf32, #tpu.memory_space<vmem>>, %arg6: memref<2x16x1xf32, #tpu.memory_space<vmem>>, %arg7: memref<2x32xf32, #tpu.memory_space<vmem>>) attributes {dimension_semantics = [#tpu.dimension_semantics<arbitrary>], iteration_bounds = array<i64: 1>, scalar_prefetch = 0 : i64, scratch_operands = 0 : i64, tpu.core_type = #tpu.core_type<tc>, window_params = [{transform_indices = @transform_0, window_bounds = array<i64: 2, 8, 32>}, {pipeline_mode = #tpu.pipeline_mode<synchronous>, transform_indices = @transform_1, window_bounds = array<i64: 32, 16>}, {pipeline_mode = #tpu.pipeline_mode<synchronous>, transform_indices = @transform_2, window_bounds = array<i64: 1, 16>}, {pipeline_mode = #tpu.pipeline_mode<synchronous>, transform_indices = @transform_3, window_bounds = array<i64: 1, 16>}, {pipeline_mode = #tpu.pipeline_mode<synchronous>, transform_indices = @transform_4, window_bounds = array<i64: 1, 1>}, {pipeline_mode = #tpu.pipeline_mode<synchronous>, transform_indices = @transform_5, window_bounds = array<i64: 2, 16, 1>}, {pipeline_mode = #tpu.pipeline_mode<synchronous>, transform_indices = @transform_6, window_bounds = array<i64: 2, 32>}]} {
    %c0 = arith.constant 0 : index
    %c0_0 = arith.constant 0 : index
    %c0_1 = arith.constant 0 : index
    %0 = vector.load %arg1[%c0, %c0_0, %c0_1] : memref<2x8x32xf32, #tpu.memory_space<vmem>>, vector<2x8x32xf32>
    %1 = vector.shape_cast %0 : vector<2x8x32xf32> to vector<16x32xf32>
    %c0_2 = arith.constant 0 : index
    %c0_3 = arith.constant 0 : index
    %2 = vector.load %arg2[%c0_2, %c0_3] : memref<32x16xf32, #tpu.memory_space<vmem>>, vector<32x16xf32>
    %cst = arith.constant dense<0.000000e+00> : vector<16x16xf32>
    %3 = tpu.matmul %1, %2, %cst {dimension_numbers = #tpu.dot_dimension_numbers<[1], [0], [0], [1], [0, 0, 1, 1], [], []>} : vector<16x32xf32>, vector<32x16xf32>, vector<16x16xf32> -> vector<16x16xf32>
    %c0_4 = arith.constant 0 : index
    %c0_5 = arith.constant 0 : index
    %4 = vector.load %arg3[%c0_4, %c0_5] : memref<1x16xf32, #tpu.memory_space<vmem>>, vector<1x16xf32>
    %5 = vector.broadcast %4 : vector<1x16xf32> to vector<16x16xf32>
    %6 = arith.addf %3, %5 : vector<16x16xf32>
    %cst_6 = arith.constant 0.000000e+00 : f32
    %7 = vector.broadcast %cst_6 : f32 to vector<16x16xf32>
    %8 = arith.maximumf %6, %7 : vector<16x16xf32>
    %c0_7 = arith.constant 0 : index
    %c0_8 = arith.constant 0 : index
    %9 = vector.load %arg4[%c0_7, %c0_8] : memref<1x16xf32, #tpu.memory_space<vmem>>, vector<1x16xf32>
    %10 = vector.broadcast %9 : vector<1x16xf32> to vector<16x16xf32>
    %11 = arith.mulf %8, %10 : vector<16x16xf32>
    %cst_9 = arith.constant dense<0.000000e+00> : vector<16xf32>
    %12 = vector.multi_reduction <add>, %11, %cst_9 [1] : vector<16x16xf32> to vector<16xf32>
    %13 = vector.shape_cast %12 : vector<16xf32> to vector<16x1xf32>
    %c0_10 = arith.constant 0 : index
    %c0_11 = arith.constant 0 : index
    %14 = vector.load %arg5[%c0_10, %c0_11] : memref<1x1xf32, #tpu.memory_space<vmem>>, vector<1x1xf32>
    %15 = vector.broadcast %14 : vector<1x1xf32> to vector<16x1xf32>
    %16 = arith.addf %13, %15 : vector<16x1xf32>
    %17 = vector.shape_cast %16 : vector<16x1xf32> to vector<2x8x1xf32>
    %cst_12 = arith.constant dense<0xFF800000> : vector<2x1xf32>
    %18 = vector.multi_reduction <maximumf>, %17, %cst_12 [1] : vector<2x8x1xf32> to vector<2x1xf32>
    %19 = vector.shape_cast %18 : vector<2x1xf32> to vector<2x1x1xf32>
    %20 = vector.broadcast %19 : vector<2x1x1xf32> to vector<2x8x1xf32>
    %21 = arith.subf %17, %20 : vector<2x8x1xf32>
    %22 = math.exp %21 : vector<2x8x1xf32>
    %cst_13 = arith.constant dense<0.000000e+00> : vector<2x1xf32>
    %23 = vector.multi_reduction <add>, %22, %cst_13 [1] : vector<2x8x1xf32> to vector<2x1xf32>
    %24 = vector.shape_cast %23 : vector<2x1xf32> to vector<2x1x1xf32>
    %25 = vector.broadcast %24 : vector<2x1x1xf32> to vector<2x8x1xf32>
    %26 = arith.divf %22, %25 : vector<2x8x1xf32>
    %27 = vector.broadcast %26 : vector<2x8x1xf32> to vector<2x8x32xf32>
    %28 = arith.mulf %0, %27 : vector<2x8x32xf32>
    %cst_14 = arith.constant dense<0.000000e+00> : vector<2x32xf32>
    %29 = vector.multi_reduction <add>, %28, %cst_14 [1] : vector<2x8x32xf32> to vector<2x32xf32>
    %c0_15 = arith.constant 0 : index
    %c0_16 = arith.constant 0 : index
    %30 = vector.load %arg7[%c0_15, %c0_16] : memref<2x32xf32, #tpu.memory_space<vmem>>, vector<2x32xf32>
    tpu.vector_store %arg7[%c0_15, %c0_16], %29 {strides = array<i32>} : memref<2x32xf32, #tpu.memory_space<vmem>>, vector<2x32xf32>,
    %cst_17 = arith.constant 0.000000e+00 : f32
    %31 = vector.broadcast %cst_17 : f32 to vector<2x8x1xf32>
    %32 = tpu.concatenate %26, %31 in 1 : vector<2x8x1xf32>, vector<2x8x1xf32> -> vector<2x16x1xf32>
    %c0_18 = arith.constant 0 : index
    %c0_19 = arith.constant 0 : index
    %c0_20 = arith.constant 0 : index
    %33 = vector.load %arg6[%c0_18, %c0_19, %c0_20] : memref<2x16x1xf32, #tpu.memory_space<vmem>>, vector<2x16x1xf32>
    tpu.vector_store %arg6[%c0_18, %c0_19, %c0_20], %32 {strides = array<i32>} : memref<2x16x1xf32, #tpu.memory_space<vmem>>, vector<2x16x1xf32>,
    return
  }
  func.func @transform_0(%arg0: i32) -> (i32, i32, i32) {
    %c0_i32 = arith.constant 0 : i32
    %c0_i32_0 = arith.constant 0 : i32
    %c0_i32_1 = arith.constant 0 : i32
    %c0_i32_2 = arith.constant 0 : i32
    return %c0_i32, %c0_i32_0, %c0_i32_1 : i32, i32, i32
  }
  func.func @transform_1(%arg0: i32) -> (i32, i32) {
    %c0_i32 = arith.constant 0 : i32
    %c0_i32_0 = arith.constant 0 : i32
    %c0_i32_1 = arith.constant 0 : i32
    return %c0_i32, %c0_i32_0 : i32, i32
  }
  func.func @transform_2(%arg0: i32) -> (i32, i32) {
    %c0_i32 = arith.constant 0 : i32
    %c0_i32_0 = arith.constant 0 : i32
    %c0_i32_1 = arith.constant 0 : i32
    return %c0_i32, %c0_i32_0 : i32, i32
  }
  func.func @transform_3(%arg0: i32) -> (i32, i32) {
    %c0_i32 = arith.constant 0 : i32
    %c0_i32_0 = arith.constant 0 : i32
    %c0_i32_1 = arith.constant 0 : i32
    return %c0_i32, %c0_i32_0 : i32, i32
  }
  func.func @transform_4(%arg0: i32) -> (i32, i32) {
    %c0_i32 = arith.constant 0 : i32
    %c0_i32_0 = arith.constant 0 : i32
    %c0_i32_1 = arith.constant 0 : i32
    return %c0_i32, %c0_i32_0 : i32, i32
  }
  func.func @transform_5(%arg0: i32) -> (i32, i32, i32) {
    %c0_i32 = arith.constant 0 : i32
    %c0_i32_0 = arith.constant 0 : i32
    %c0_i32_1 = arith.constant 0 : i32
    %c0_i32_2 = arith.constant 0 : i32
    return %c0_i32, %c0_i32_0, %c0_i32_1 : i32, i32, i32
  }
  func.func @transform_6(%arg0: i32) -> (i32, i32) {
    %c0_i32 = arith.constant 0 : i32
    %c0_i32_0 = arith.constant 0 : i32
    %c0_i32_1 = arith.constant 0 : i32
    return %c0_i32, %c0_i32_0 : i32, i32
  }
}

</mosaic_0001>

<bundles_post_ra>
// kernel: tpu_custom_call.1
= control target key start
LH: loop header
LB: loop body
LE: loop exit
PB: predicated region body
PF: predicated region fallthrough
CT: control target
= control target key end

     0   :  { %s399_s0 = inlined_call_operand.vmem [shape: f32[2,16,32], index: 0, kind: input, shape index: {}]   ;;  %s400_s1 = inlined_call_operand.vmem [shape: f32[32,16], index: 1, kind: input, shape index: {}]   ;;  %s401_s2 = inlined_call_operand.vmem [shape: f32[1,16], index: 2, kind: input, shape index: {}]   ;;  %s402_s3 = inlined_call_operand.vmem [shape: f32[1,16], index: 3, kind: input, shape index: {}]   ;;  %s403_s4 = inlined_call_operand.<no memory space> [shape: f32[1,1], index: 4, kind: input, shape index: {}]   ;;  %s404_s5 = inlined_call_operand.vmem [shape: f32[2,16,1], index: 5, kind: output, shape index: {0}]   ;;  %s405_s6 = inlined_call_operand.hbm [shape: f32[2,32], index: 6, kind: output, shape index: {1}]  }
   0x1   :  { %v12_v0 = vstv %s403_s4 }
   0x2   :  { %13 = vst [vmem:[#allocation2] sm:$0x1] %v12_v0 }
   0x3   :  { %v69_v1 = vld [vmem:[%s400_s1 + $0x18] sm:$0xff]  ;;  %v68_v2 = vld [vmem:[%s400_s1 + $0x10] sm:$0xff]  ;;  %v67_v3 = vld [vmem:[%s400_s1 + $0x8] sm:$0xff] }
   0x4   :  { %93 = vmatpush.msra.mxu0 %v69_v1  ;;  %253 = vmatpush.msra.mxu1 %v69_v1 }
   0x6   :  { %94 = vmatpush.msra.mxu0 %v68_v2  ;;  %254 = vmatpush.msra.mxu1 %v68_v2 }
   0x7   :  { %14 = vsyncpa [#allocation5], 0  ;;  %v66_v4 = vld [vmem:[%s400_s1] sm:$0xff]  ;;  %vm74_vm0 = vcmask 261120   ;;  %v360_v6 = vld [vmem:[%s399_s0 + $0x10] sm:$0xff]  ;;  %vm125_vm1 = vcmask 7168  }
   0x8   :  { %95 = vmatpush.msra.mxu0 %v67_v3  ;;  %v355_v5 = vld [vmem:[%s399_s0] sm:$0xff]  ;;  %255 = vmatpush.msra.mxu1 %v67_v3  ;;  %v299_v7 = vmov 0.0   ;;  %vm112_vm2 = vcmask 130048   ;;  %v300_v37 = vmov 0   ;;  %s236_s21 = sshll.u32 %s405_s6, 4  ;;  %vm218_vm11 = vcmask 1041409   ;;  %s237_s21 = int_to_ptr.hbm [resolvable:$true] %s236_s21 }
   0x9   :  { %224 = vst.msk [vmem:[%s404_s5 + $0x8] sm:$0xff] %vm125_vm1, %v299_v7  ;;  %v262_v8 = vld [vmem:[%s401_s2] ss:$0 sm:$0xff]  ;;  %260 = vset.pattern.permute.xlu1 %v300_v37  ;;  %261 = vset.pattern.permute.xlu0 %v300_v37  ;;  %vm221_vm12 = vcmask 254976  }
   0xa   :  { %96 = vmatpush.msra.mxu0 %v66_v4  ;;  %256 = vmatpush.msra.mxu1 %v66_v4  ;;  %226 = vst.msk [vmem:[%s404_s5 + $0x18] sm:$0xff] %vm125_vm1, %v299_v7  ;;  %v263_v13 = vld [vmem:[%s402_s3] ss:$0 sm:$0xff] }
   0xb   :  { %251 = vmatmul.msk.f32.vlgmr.msra.gmra.mxu0 %vm74_vm0, %v355_v5  ;;  %252 = vmatmul.msk.f32.vlgmr.msra.gmra.mxu1 %vm74_vm0, %v360_v6  ;;  %v264_v20 = vld [vmem:[#allocation2] ss:$0 sm:$0xff] }
  0x88   :  { %v98_v9 = vpop.f32.mrf.mxu0  ;;  %v101_v10 = vpop.f32.mrf.mxu1 }
  0x89   :  { %v99_v11 = vadd.f32 %v262_v8, %v98_v9  ;;  %v102_v12 = vadd.f32 %v262_v8, %v101_v10 }
  0x8b   :  { %v104_v14 = vmax.f32 %v99_v11, 0.0  ;;  %v105_v15 = vmax.f32 %v102_v12, 0.0 }
  0x8d   :  { %v110_v16 = vmul.f32 %v263_v13, %v104_v14  ;;  %v111_v18 = vmul.f32 %v263_v13, %v105_v15 }
  0x8f   :  { %v113_v17 = vsel %vm112_vm2, %v110_v16, 0.0  ;;  %v116_v19 = vsel %vm112_vm2, %v111_v18, 0.0 }
  0x90   :  { %114 = vadd.xlane.f32.xlu0 %v113_v17 }
  0x98   :  { %117 = vadd.xlane.f32.xlu0 %v116_v19 }
 0x103   :  { %v115_v21 = vpop.xlane.xlu0 %114 }
 0x104   :  { %v123_v22 = vadd.f32 %v264_v20, %v115_v21 }
 0x106   :  { %v126_v23 = vsel %vm125_vm1, %v123_v22, -inf }
 0x107   :  { %v127_v24 = vrot.slane %v126_v23, 4 }
 0x109   :  { %v128_v25 = vmax.f32 %v126_v23, %v127_v24 }
 0x10b   :  { %v129_v26 = vrot.slane %v128_v25, 2  ;;  %v118_v27 = vpop.xlane.xlu0 %117 }
 0x10c   :  { %v124_v28 = vadd.f32 %v264_v20, %v118_v27 }
 0x10d   :  { %v130_v29 = vmax.f32 %v128_v25, %v129_v26 }
 0x10e   :  { %v133_v30 = vsel %vm125_vm1, %v124_v28, -inf }
 0x10f   :  { %v131_v31 = vrot.slane %v130_v29, 1  ;;  %v134_v32 = vrot.slane %v133_v30, 4 }
 0x111   :  { %v132_v33 = vmax.f32 %v130_v29, %v131_v31  ;;  %v135_v34 = vmax.f32 %v133_v30, %v134_v32 }
 0x113   :  { %v140_v35 = vsub.f32 %v123_v22, %v132_v33  ;;  %v136_v36 = vrot.slane %v135_v34, 2 }
 0x115   :  { %v142_v38 = vmul.f32 1.442695, %v140_v35  ;;  %v137_v39 = vmax.f32 %v135_v34, %v136_v36 }
 0x117   :  { %265 = vpow2.f32 %v142_v38  ;;  %v138_v40 = vrot.slane %v137_v39, 1 }
 0x119   :  { %v139_v41 = vmax.f32 %v137_v39, %v138_v40 }
 0x11b   :  { %v141_v42 = vsub.f32 %v124_v28, %v139_v41 }
 0x11d   :  { %v266_v43 = vpop.eup %265  ;;  %v144_v44 = vmul.f32 1.442695, %v141_v42 }
 0x11e   :  { %v146_v45 = vsel %vm125_vm1, %v266_v43, 0.0 }
 0x11f   :  { %v147_v46 = vrot.slane %v146_v45, 4  ;;  %267 = vpow2.f32 %v144_v44 }
 0x121   :  { %v148_v47 = vadd.f32 %v147_v46, %v146_v45 }
 0x123   :  { %v149_v48 = vrot.slane %v148_v47, 2 }
 0x125   :  { %v268_v49 = vpop.eup %267  ;;  %v150_v50 = vadd.f32 %v149_v48, %v148_v47 }
 0x126   :  { %v153_v51 = vsel %vm125_vm1, %v268_v49, 0.0 }
 0x127   :  { %v151_v52 = vrot.slane %v150_v50, 1  ;;  %v154_v53 = vrot.slane %v153_v51, 4 }
 0x129   :  { %v152_v54 = vadd.f32 %v151_v52, %v150_v50  ;;  %v155_v55 = vadd.f32 %v154_v53, %v153_v51 }
 0x12b   :  { %269 = vrcp.f32 %v152_v54  ;;  %v156_v56 = vrot.slane %v155_v55, 2  ;;  %v171_v63 = vand.u32 2147483648, %v152_v54  ;;  %v169_v1 = vand.u32 2147483647, %v152_v54 }
 0x12c   :  { %vm165_vm4 = vweird.f32 %v152_v54 }
 0x12d   :  { %v157_v57 = vadd.f32 %v156_v56, %v155_v55  ;;  %v172_v4 = vor.u32 1.1754944e-38, %v171_v63  ;;  %vm170_vm6 = vcmp.eq.f32.partialorder %v169_v1, 8.507059e+37 }
 0x12f   :  { %v158_v58 = vrot.slane %v157_v57, 1 }
 0x131   :  { %v270_v59 = vpop.eup %269  ;;  %v159_v60 = vadd.f32 %v158_v58, %v157_v57 }
 0x132   :  { %v161_v61 = vmul.f32 %v270_v59, %v152_v54  ;;  %vm166_vm3 = vweird.f32 %v270_v59 }
 0x133   :  { %271 = vrcp.f32 %v159_v60  ;;  %vm167_vm5 = vmor %vm165_vm4, %vm166_vm3  ;;  %v186_v12 = vand.u32 2147483648, %v159_v60  ;;  %v184_v14 = vand.u32 2147483647, %v159_v60  ;;  %vm180_vm8 = vweird.f32 %v159_v60 }
 0x134   :  { %v162_v62 = vsub.f32 1.0, %v161_v61 }
 0x135   :  { %v187_v16 = vor.u32 1.1754944e-38, %v186_v12  ;;  %vm185_vm10 = vcmp.eq.f32.partialorder %v184_v14, 8.507059e+37 }
 0x136   :  { %v163_v0 = vmul.f32 %v270_v59, %v162_v62 }
 0x138   :  { %v164_v2 = vadd.f32 %v270_v59, %v163_v0 }
 0x139   :  { %v272_v3 = vpop.eup %271 }
 0x13a   :  { %v168_v7 = vsel %vm167_vm5, %v270_v59, %v164_v2  ;;  %v176_v8 = vmul.f32 %v272_v3, %v159_v60  ;;  %vm181_vm7 = vweird.f32 %v272_v3 }
 0x13b   :  { %v173_v9 = vsel %vm170_vm6, %v172_v4, %v168_v7  ;;  %vm182_vm9 = vmor %vm180_vm8, %vm181_vm7 }
 0x13c   :  { %v174_v10 = vmul.f32 %v266_v43, %v173_v9  ;;  %v177_v11 = vsub.f32 1.0, %v176_v8 }
 0x13e   :  { %192 = vperm.xlu1 %260, %v174_v10   ;;  %223 = vst.msk [vmem:[%s404_s5] sm:$0xff] %vm125_vm1, %v174_v10  ;;  %v178_v13 = vmul.f32 %v272_v3, %v177_v11 }
 0x140   :  { %v179_v15 = vadd.f32 %v272_v3, %v178_v13 }
 0x142   :  { %v183_v17 = vsel %vm182_vm9, %v272_v3, %v179_v15 }
 0x143   :  { %v188_v18 = vsel %vm185_vm10, %v187_v16, %v183_v17 }
 0x144   :  { %v189_v19 = vmul.f32 %v268_v49, %v188_v18 }
 0x146   :  { %197 = vperm.xlu1 %260, %v189_v19   ;;  %225 = vst.msk [vmem:[%s404_s5 + $0x10] sm:$0xff] %vm125_vm1, %v189_v19  ;;  %s301_s5 = smov [#allocation4]  }
 0x147   :  { %s234_s18 = sshll.u32 %s301_s5, 4  ;;  %s235_s18 = int_to_ptr.vmem [resolvable:$true] %s234_s18 }
 0x1b0   :  { %v193_v20 = vpop.permute.xlu1 %192 }
 0x1b1   :  { %v200_v21 = vmul.f32 %v193_v20, %v355_v5 }
 0x1b3   :  { %v202_v22 = vsel %vm74_vm0, %v200_v21, 0.0 }
 0x1b4   :  { %v203_v23 = vrot.slane %v202_v22, 4 }
 0x1b6   :  { %v204_v24 = vadd.f32 %v203_v23, %v202_v22 }
 0x1b8   :  { %v198_v25 = vpop.permute.xlu1 %197  ;;  %v205_v27 = vrot.slane %v204_v24, 2 }
 0x1b9   :  { %v201_v26 = vmul.f32 %v198_v25, %v360_v6 }
 0x1ba   :  { %v206_v30 = vadd.f32 %v205_v27, %v204_v24 }
 0x1bb   :  { %v209_v28 = vsel %vm74_vm0, %v201_v26, 0.0 }
 0x1bc   :  { %v210_v29 = vrot.slane %v209_v28, 4  ;;  %v207_v33 = vrot.slane %v206_v30, 1 }
 0x1be   :  { %v211_v31 = vadd.f32 %v210_v29, %v209_v28  ;;  %v208_v5 = vadd.f32 %v207_v33, %v206_v30 }
 0x1c0   :  { %v212_v32 = vrot.slane %v211_v31, 2 }
 0x1c2   :  { %v213_v34 = vadd.f32 %v212_v32, %v211_v31 }
 0x1c4   :  { %v214_v35 = vrot.slane %v213_v34, 1 }
 0x1c6   :  { %v215_v36 = vadd.f32 %v214_v35, %v213_v34 }
 0x1c8   :  { %v219_v6 = vsel %vm218_vm11, %v215_v36, %v208_v5 }
 0x1c9   :  { %222 = vst.msk [vmem:[#allocation4] sm:$0x3] %vm221_vm12, %v219_v6 }
 0x1ca   :  { %239 = dma.vmem_to_hbm [thread:$0]  %s235_s18, 32, %s237_s21, [#allocation5]  }
 0x1cb   :  { %297 = dma.done.wait [#allocation5], 32  }
 0x1cc   :  { %298 = vsyncadd [#allocation5], 4294967264 }
 0x1cd   :  { %246 = vsyncpa [#allocation5], 1 }

</bundles_post_ra>
